<compile_context>
chip_gen: v6e
topology: v6e:2x2x1
jax: 0.10.0
libtpu: 0.0.40
codegen_flags: <defaults>
</compile_context>

<pallas_src>
import functools

import jax
import jax.numpy as jnp
from jax.experimental import pallas as pl
from jax.experimental.pallas import tpu as pltpu

_MIB = 1024 * 1024


# --------------------------------------------------------------------------- #
# Kernel
# --------------------------------------------------------------------------- #
def mlp_block_kernel(x_ref, w1_ref, b1_ref, w2_ref, b2_ref, o_ref, acc_ref):
    """grid = (batch_tiles, 4H_tiles); the 4H (reduction) axis is LAST."""
    n = pl.program_id(1)

    # fc1 chunk: (TB, Hp) @ (Hp, TN) + b1 chunk -> ReLU (f32 MXU accumulation).
    h = jnp.dot(x_ref[...], w1_ref[...], preferred_element_type=jnp.float32)
    h = jnp.maximum(h + b1_ref[...].astype(jnp.float32), 0.0)

    # fc2 partial product of this 4H chunk (f32 accumulation; only the MXU
    # operand is downcast when the weights are bf16).
    partial = jnp.dot(h.astype(w2_ref.dtype), w2_ref[...],
                      preferred_element_type=jnp.float32)

    # No redundant zero-fill: first step stores, later steps accumulate.
    @pl.when(n == 0)
    def _():
        acc_ref[...] = partial

    @pl.when(n > 0)
    def _():
        acc_ref[...] += partial

    @pl.when(n == pl.num_programs(1) - 1)
    def _():
        y = acc_ref[...] + b2_ref[...].astype(jnp.float32)
        o_ref[...] = jnp.maximum(y, 0.0).astype(o_ref.dtype)


# --------------------------------------------------------------------------- #
# Tiling / VMEM helpers (all trace-time Python on static shapes)
# --------------------------------------------------------------------------- #
def _round_up(x, m):
    return ((x + m - 1) // m) * m


@functools.lru_cache(maxsize=1)
def _vmem_capacity_bytes():
    """Physical VMEM per TensorCore (128 MiB v5e/v6e, 64 MiB v7x)."""
    try:
        info = pltpu.get_tpu_info()
        cap = int(getattr(info, "vmem_capacity_bytes", 0) or 0)
        if cap > 0:
            return cap
    except Exception:
        pass
    try:
        kind = jax.devices()[0].device_kind.lower()
        if "7" in kind:
            return 64 * _MIB
        if "v5" in kind or "v6" in kind or "v4" in kind:
            return 128 * _MIB
    except Exception:
        pass
    return 64 * _MIB  # conservative: legal on every generation


def _vmem_need_bytes(tb, tn, hp, h4p, a_bytes, w_bytes):
    """Per-kernel VMEM working set for a (tb, tn) tiling choice."""
    nbuf = 1 if tn >= h4p else 2          # weights single-buffered when resident
    return (2 * tb * hp * a_bytes         # x tile (double-buffered)
            + 2 * tb * hp * a_bytes       # out tile (double-buffered)
            + tb * hp * 4                 # f32 accumulator scratch
            + nbuf * hp * tn * w_bytes    # W1 chunk
            + nbuf * tn * hp * w_bytes    # W2 chunk
            + nbuf * tn * w_bytes         # b1 chunk
            + nbuf * hp * w_bytes)        # b2


def _select_tiles(b_pad, hp, h4p, a_bytes, w_bytes, budget, row_align):
    """Pick (tb, tn) minimizing estimated memory traffic under the VMEM budget.

    Weight HBM re-streaming scales with the number of batch tiles, so a large
    batch tile is the primary lever; tn only needs to be big enough
    (multiples of 256 for the 256-wide MXU) to amortize the f32 accumulator
    read-modify-write.
    """
    # Batch-tile candidates (descending), capped at 1024 rows.
    tb_cands = []
    for c in (1024, 896, 768, 640, 512, 384, 320, 256, 192, 128, 96, 64, 48, 32, 16, 8):
        c = max(row_align, _round_up(min(c, b_pad), row_align))
        if c not in tb_cands:
            tb_cands.append(c)
    tb_cands.sort(reverse=True)

    # 4H-tile candidates (descending): full 4H first (weights resident), then
    # MXU-aligned chunks (multiples of 256; 128 only for tiny models).
    step = 256 if h4p >= 256 else 128
    tn_cands = [h4p]
    c = (h4p // step) * step
    while c >= step:
        if c < h4p:
            tn_cands.append(c)
        c -= step

    weight_bytes = (hp * h4p * 2 + h4p + hp) * w_bytes  # W1 + W2 + b1 + b2
    best = None
    for tb in tb_cands:
        for tn in tn_cands:
            if _vmem_need_bytes(tb, tn, hp, h4p, a_bytes, w_bytes) > budget:
                continue
            bp = _round_up(b_pad, tb)
            n_btiles = bp // tb
            n_ksteps = -(-h4p // tn)
            # HBM: weights streamed once per batch tile; activations once.
            hbm = n_btiles * weight_bytes + 2 * bp * hp * a_bytes
            # VMEM accumulator RMW per extra reduction step (cheap vs HBM).
            acc_rmw = 0.1 * (n_ksteps - 1) * 2 * bp * hp * 4
            cost = hbm + acc_rmw
            if n_btiles > 1 and n_btiles % 2 == 1:
                cost *= 1.05  # prefer an even tile count (v7x megacore balance)
            if best is None or cost < best[0]:
                best = (cost, tb, tn)
    if best is None:  # nothing fits (would need an absurdly large hidden dim)
        return row_align, min(h4p, step)
    return best[1], best[2]


# --------------------------------------------------------------------------- #
# Wrapper
# --------------------------------------------------------------------------- #
@functools.partial(jax.jit, static_argnames=("tile_b", "tile_n", "use_bf16_matmul"))
def mlp_block(x, w1, b1, w2, b2, *, tile_b=None, tile_n=None, use_bf16_matmul=False):
    """y = relu(relu(x @ w1 + b1) @ w2 + b2).

    x: (B, H); w1: (H, 4H); b1: (4H,) or (1, 4H); w2: (4H, H); b2: (H,) or (1, H).
    Weights are stored (in, out), i.e. transposed vs PyTorch nn.Linear.weight.
    """
    B, H = x.shape
    H4 = w1.shape[1]
    assert w1.shape == (H, H4) and w2.shape == (H4, H)
    b1 = b1.reshape(1, H4)
    b2 = b2.reshape(1, H)
    out_dtype = x.dtype

    if use_bf16_matmul:
        # bf16 MXU operands + f32 accumulation; halves weight HBM traffic.
        x, w1, b1, w2, b2 = (a.astype(jnp.bfloat16) for a in (x, w1, b1, w2, b2))

    a_bytes = jnp.dtype(x.dtype).itemsize
    w_bytes = jnp.dtype(w1.dtype).itemsize

    # ---- lane/sublane aligned padding (256 alignment for the v6e/v7x MXU) ---
    hp = _round_up(H, 256 if H >= 256 else 128)
    h4p = _round_up(H4, 256 if H4 >= 256 else 128)
    row_align = 16 if a_bytes == 2 else 8      # bf16 packs 16 rows per vreg
    b_pad = _round_up(B, row_align)

    cap = _vmem_capacity_bytes()
    budget = int(cap * 0.70)                   # ~90 MiB on 128 MiB parts, ~45 on v7x

    tb_auto, tn_auto = _select_tiles(b_pad, hp, h4p, a_bytes, w_bytes, budget, row_align)
    tb = tb_auto if tile_b is None else max(
        row_align, _round_up(min(tile_b, b_pad), row_align))
    tn = tn_auto if tile_n is None else min(_round_up(tile_n, 128), h4p)

    bp = _round_up(b_pad, tb)                  # no rows silently dropped
    h4p = _round_up(h4p, tn)
    weights_resident = (h4p // tn) == 1

    xp = jnp.pad(x, ((0, bp - B), (0, hp - H)))
    w1p = jnp.pad(w1, ((0, hp - H), (0, h4p - H4)))
    b1p = jnp.pad(b1, ((0, 0), (0, h4p - H4)))
    w2p = jnp.pad(w2, ((0, h4p - H4), (0, hp - H)))
    b2p = jnp.pad(b2, ((0, 0), (0, hp - H)))

    grid = (bp // tb, h4p // tn)               # reduction (4H) axis last

    # VMEM limit: enough for the working set, never above physical capacity
    # (v7x has only 64 MiB per TensorCore).
    need = _vmem_need_bytes(tb, tn, hp, h4p, a_bytes, w_bytes)
    vmem_limit = int(min(cap - 8 * _MIB, max(2 * need, need + 4 * _MIB, 32 * _MIB)))

    # Truthful advisory cost: weights re-streamed once per batch tile.
    n_btiles = bp // tb
    weight_stream = (w1p.size + b1p.size + w2p.size + b2p.size) * w_bytes
    cost = pl.CostEstimate(
        flops=4 * bp * hp * h4p,               # two matmuls @ 2*M*N*K flops
        transcendentals=0,
        bytes_accessed=int(n_btiles * weight_stream
                           + xp.size * a_bytes
                           + bp * hp * jnp.dtype(out_dtype).itemsize),
    )

    # Constant-index blocks are single-buffered when the weights are fully
    # resident (inner grid extent 1): frees VMEM for a larger batch tile.
    w_mode = dict(pipeline_mode=pl.Buffered(1)) if weights_resident else {}
    in_specs = [
        pl.BlockSpec((tb, hp), lambda i, n: (i, 0)),             # x tile
        pl.BlockSpec((hp, tn), lambda i, n: (0, n), **w_mode),   # W1 chunk
        pl.BlockSpec((1, tn), lambda i, n: (0, n), **w_mode),    # b1 chunk
        pl.BlockSpec((tn, hp), lambda i, n: (n, 0), **w_mode),   # W2 chunk
        pl.BlockSpec((1, hp), lambda i, n: (0, 0), **w_mode),    # b2
    ]

    out = pl.pallas_call(
        mlp_block_kernel,
        out_shape=jax.ShapeDtypeStruct((bp, hp), out_dtype),
        grid_spec=pltpu.PrefetchScalarGridSpec(
            num_scalar_prefetch=0,
            grid=grid,
            in_specs=in_specs,
            out_specs=pl.BlockSpec((tb, hp), lambda i, n: (i, 0)),
            scratch_shapes=[pltpu.VMEM((tb, hp), jnp.float32)],
        ),
        compiler_params=pltpu.CompilerParams(
            dimension_semantics=("parallel", "arbitrary"),
            vmem_limit_bytes=vmem_limit,
        ),
        cost_estimate=cost,
    )(xp, w1p, b1p, w2p, b2p)

    return out[:B, :H]


# --------------------------------------------------------------------------- #
# Reference & init (pure JAX, f32-accurate)
# --------------------------------------------------------------------------- #
def init_params(key, hidden_dim, dtype=jnp.float32):
    """Matches nn.Linear's U(-1/sqrt(fan_in), 1/sqrt(fan_in)); weights stored (in, out)."""
    k1, k2, k3, k4 = jax.random.split(key, 4)
    h4 = hidden_dim * 4
    bound1 = 1.0 / jnp.sqrt(hidden_dim)
    bound2 = 1.0 / jnp.sqrt(h4)
    w1 = jax.random.uniform(k1, (hidden_dim, h4), dtype, -bound1, bound1)
    b1 = jax.random.uniform(k2, (1, h4), dtype, -bound1, bound1)
    w2 = jax.random.uniform(k3, (h4, hidden_dim), dtype, -bound2, bound2)
    b2 = jax.random.uniform(k4, (1, hidden_dim), dtype, -bound2, bound2)
    return w1, b1, w2, b2


def mlp_block_ref(x, w1, b1, w2, b2):
    x, w1, b1, w2, b2 = (a.astype(jnp.float32) for a in (x, w1, b1, w2, b2))
    hi = jax.lax.Precision.HIGHEST  # avoid TPU's default bf16 matmul in the ref
    h = jnp.maximum(jnp.dot(x, w1, precision=hi) + b1.reshape(1, -1), 0.0)
    return jnp.maximum(jnp.dot(h, w2, precision=hi) + b2.reshape(1, -1), 0.0)


if __name__ == "__main__":
    key = jax.random.PRNGKey(0)
    kx, kp = jax.random.split(key)

    batch, hidden_dim = 8, 32          # small demo shapes (padded to 128 lanes)
    x = jax.random.normal(kx, (batch, hidden_dim), jnp.float32)
    w1, b1, w2, b2 = init_params(kp, hidden_dim, jnp.float32)
    ref = mlp_block_ref(x, w1, b1, w2, b2)

    # f32 path (f32 MXU multi-pass, f32 accumulation)
    out = jax.block_until_ready(mlp_block(x, w1, b1, w2, b2))
    assert out.shape == (batch, hidden_dim)
    assert jnp.allclose(out, ref, atol=1e-4, rtol=1e-4)

    # bf16 weights/activations path (MXU-native; f32 accumulation inside kernel)
    xb, w1b, b1b, w2b, b2b = (a.astype(jnp.bfloat16) for a in (x, w1, b1, w2, b2))
    out_bf16 = jax.block_until_ready(mlp_block(xb, w1b, b1b, w2b, b2b))
    assert out_bf16.shape == (batch, hidden_dim)
    assert jnp.allclose(out_bf16.astype(jnp.float32), ref, atol=1e-1, rtol=1e-1)

    # f32 inputs, bf16 MXU operands (optional fast path behind a flag)
    out_fast = jax.block_until_ready(mlp_block(x, w1, b1, w2, b2, use_bf16_matmul=True))
    assert out_fast.shape == (batch, hidden_dim)
    assert jnp.allclose(out_fast, ref, atol=1e-1, rtol=1e-1)

    print("KERNEL_OK")
</pallas_src>

<mosaic_0001>
module attributes {stable_mosaic.version = 11 : i64} {
  func.func @mlp_block_kernel(%arg0: i32, %arg1: i32, %arg2: memref<8x128xf32, #tpu.memory_space<vmem>>, %arg3: memref<128x128xf32, #tpu.memory_space<vmem>>, %arg4: memref<1x128xf32, #tpu.memory_space<vmem>>, %arg5: memref<128x128xf32, #tpu.memory_space<vmem>>, %arg6: memref<1x128xf32, #tpu.memory_space<vmem>>, %arg7: memref<8x128xf32, #tpu.memory_space<vmem>>, %arg8: memref<8x128xf32, #tpu.memory_space<vmem>>) attributes {dimension_semantics = [#tpu.dimension_semantics<parallel>, #tpu.dimension_semantics<arbitrary>], iteration_bounds = array<i64: 1, 1>, scalar_prefetch = 0 : i64, scratch_operands = 1 : i64, tpu.core_type = #tpu.core_type<tc>, window_params = [{transform_indices = @transform_0, window_bounds = array<i64: 8, 128>}, {pipeline_mode = #tpu.pipeline_mode<synchronous>, transform_indices = @transform_1, window_bounds = array<i64: 128, 128>}, {pipeline_mode = #tpu.pipeline_mode<synchronous>, transform_indices = @transform_2, window_bounds = array<i64: 1, 128>}, {pipeline_mode = #tpu.pipeline_mode<synchronous>, transform_indices = @transform_3, window_bounds = array<i64: 128, 128>}, {pipeline_mode = #tpu.pipeline_mode<synchronous>, transform_indices = @transform_4, window_bounds = array<i64: 1, 128>}, {transform_indices = @transform_5, window_bounds = array<i64: 8, 128>}]} {
    %c0 = arith.constant 0 : index
    %c0_0 = arith.constant 0 : index
    %0 = vector.load %arg2[%c0, %c0_0] : memref<8x128xf32, #tpu.memory_space<vmem>>, vector<8x128xf32>
    %c0_1 = arith.constant 0 : index
    %c0_2 = arith.constant 0 : index
    %1 = vector.load %arg3[%c0_1, %c0_2] : memref<128x128xf32, #tpu.memory_space<vmem>>, vector<128x128xf32>
    %cst = arith.constant dense<0.000000e+00> : vector<8x128xf32>
    %2 = tpu.matmul %0, %1, %cst {dimension_numbers = #tpu.dot_dimension_numbers<[1], [0], [0], [1], [0, 0, 1, 1], [], []>} : vector<8x128xf32>, vector<128x128xf32>, vector<8x128xf32> -> vector<8x128xf32>
    %c0_3 = arith.constant 0 : index
    %c0_4 = arith.constant 0 : index
    %3 = vector.load %arg4[%c0_3, %c0_4] : memref<1x128xf32, #tpu.memory_space<vmem>>, vector<1x128xf32>
    %4 = vector.broadcast %3 : vector<1x128xf32> to vector<8x128xf32>
    %5 = arith.addf %2, %4 : vector<8x128xf32>
    %cst_5 = arith.constant 0.000000e+00 : f32
    %6 = vector.broadcast %cst_5 : f32 to vector<8x128xf32>
    %7 = arith.maximumf %5, %6 : vector<8x128xf32>
    %c0_6 = arith.constant 0 : index
    %c0_7 = arith.constant 0 : index
    %8 = vector.load %arg5[%c0_6, %c0_7] : memref<128x128xf32, #tpu.memory_space<vmem>>, vector<128x128xf32>
    %cst_8 = arith.constant dense<0.000000e+00> : vector<8x128xf32>
    %9 = tpu.matmul %7, %8, %cst_8 {dimension_numbers = #tpu.dot_dimension_numbers<[1], [0], [0], [1], [0, 0, 1, 1], [], []>} : vector<8x128xf32>, vector<128x128xf32>, vector<8x128xf32> -> vector<8x128xf32>
    %c0_i32 = arith.constant 0 : i32
    %10 = arith.cmpi eq, %arg1, %c0_i32 : i32
    %11 = arith.extui %10 : i1 to i32
    %c0_i32_9 = arith.constant 0 : i32
    %12 = arith.cmpi ne, %11, %c0_i32_9 : i32
    scf.if %12 {
      %c0_14 = arith.constant 0 : index
      %c0_15 = arith.constant 0 : index
      %19 = vector.load %arg8[%c0_14, %c0_15] : memref<8x128xf32, #tpu.memory_space<vmem>>, vector<8x128xf32>
      tpu.vector_store %arg8[%c0_14, %c0_15], %9 {strides = array<i32>} : memref<8x128xf32, #tpu.memory_space<vmem>>, vector<8x128xf32>,
    } else {
    }
    %c0_i32_10 = arith.constant 0 : i32
    %13 = arith.cmpi sgt, %arg1, %c0_i32_10 : i32
    %14 = arith.extui %13 : i1 to i32
    %c0_i32_11 = arith.constant 0 : i32
    %15 = arith.cmpi ne, %14, %c0_i32_11 : i32
    scf.if %15 {
      %c0_14 = arith.constant 0 : index
      %c0_15 = arith.constant 0 : index
      %19 = vector.load %arg8[%c0_14, %c0_15] : memref<8x128xf32, #tpu.memory_space<vmem>>, vector<8x128xf32>
      %20 = arith.addf %19, %9 : vector<8x128xf32>
      %c0_16 = arith.constant 0 : index
      %c0_17 = arith.constant 0 : index
      %21 = vector.load %arg8[%c0_16, %c0_17] : memref<8x128xf32, #tpu.memory_space<vmem>>, vector<8x128xf32>
      tpu.vector_store %arg8[%c0_16, %c0_17], %20 {strides = array<i32>} : memref<8x128xf32, #tpu.memory_space<vmem>>, vector<8x128xf32>,
    } else {
    }
    %c0_i32_12 = arith.constant 0 : i32
    %16 = arith.cmpi eq, %arg1, %c0_i32_12 : i32
    %17 = arith.extui %16 : i1 to i32
    %c0_i32_13 = arith.constant 0 : i32
    %18 = arith.cmpi ne, %17, %c0_i32_13 : i32
    scf.if %18 {
      %c0_14 = arith.constant 0 : index
      %c0_15 = arith.constant 0 : index
      %19 = vector.load %arg8[%c0_14, %c0_15] : memref<8x128xf32, #tpu.memory_space<vmem>>, vector<8x128xf32>
      %c0_16 = arith.constant 0 : index
      %c0_17 = arith.constant 0 : index
      %20 = vector.load %arg6[%c0_16, %c0_17] : memref<1x128xf32, #tpu.memory_space<vmem>>, vector<1x128xf32>
      %21 = vector.broadcast %20 : vector<1x128xf32> to vector<8x128xf32>
      %22 = arith.addf %19, %21 : vector<8x128xf32>
      %cst_18 = arith.constant 0.000000e+00 : f32
      %23 = vector.broadcast %cst_18 : f32 to vector<8x128xf32>
      %24 = arith.maximumf %22, %23 : vector<8x128xf32>
      %c0_19 = arith.constant 0 : index
      %c0_20 = arith.constant 0 : index
      %25 = vector.load %arg7[%c0_19, %c0_20] : memref<8x128xf32, #tpu.memory_space<vmem>>, vector<8x128xf32>
      tpu.vector_store %arg7[%c0_19, %c0_20], %24 {strides = array<i32>} : memref<8x128xf32, #tpu.memory_space<vmem>>, vector<8x128xf32>,
    } else {
    }
    return
  }
  func.func @transform_0(%arg0: i32, %arg1: i32) -> (i32, i32) {
    %c0_i32 = arith.constant 0 : i32
    %c0_i32_0 = arith.constant 0 : i32
    return %arg0, %c0_i32 : i32, i32
  }
  func.func @transform_1(%arg0: i32, %arg1: i32) -> (i32, i32) {
    %c0_i32 = arith.constant 0 : i32
    %c0_i32_0 = arith.constant 0 : i32
    return %c0_i32, %arg1 : i32, i32
  }
  func.func @transform_2(%arg0: i32, %arg1: i32) -> (i32, i32) {
    %c0_i32 = arith.constant 0 : i32
    %c0_i32_0 = arith.constant 0 : i32
    return %c0_i32, %arg1 : i32, i32
  }
  func.func @transform_3(%arg0: i32, %arg1: i32) -> (i32, i32) {
    %c0_i32 = arith.constant 0 : i32
    %c0_i32_0 = arith.constant 0 : i32
    return %arg1, %c0_i32 : i32, i32
  }
  func.func @transform_4(%arg0: i32, %arg1: i32) -> (i32, i32) {
    %c0_i32 = arith.constant 0 : i32
    %c0_i32_0 = arith.constant 0 : i32
    %c0_i32_1 = arith.constant 0 : i32
    return %c0_i32, %c0_i32_0 : i32, i32
  }
  func.func @transform_5(%arg0: i32, %arg1: i32) -> (i32, i32) {
    %c0_i32 = arith.constant 0 : i32
    %c0_i32_0 = arith.constant 0 : i32
    return %arg0, %c0_i32 : i32, i32
  }
}

</mosaic_0001>

<bundles_post_ra>
// kernel: mlp_block.1
= control target key start
LH: loop header
LB: loop body
LE: loop exit
PB: predicated region body
PF: predicated region fallthrough
CT: control target
= control target key end

     0   :  { %v373_v1 = vmov 0.0   ;;  %vm374_vm0 = vmmov 0   ;;  %s548_s0 = inlined_call_operand.vmem [shape: f32[8,128], index: 0, kind: input, shape index: {}]   ;;  %s549_s1 = inlined_call_operand.vmem [shape: f32[128,128], index: 1, kind: input, shape index: {}]   ;;  %s550_s2 = inlined_call_operand.vmem [shape: f32[1,128], index: 2, kind: input, shape index: {}]   ;;  %s551_s3 = inlined_call_operand.vmem [shape: f32[128,128], index: 3, kind: input, shape index: {}]   ;;  %s552_s4 = inlined_call_operand.vmem [shape: f32[1,128], index: 4, kind: input, shape index: {}]   ;;  %s553_s5 = inlined_call_operand.hbm [shape: f32[8,128], index: 5, kind: output, shape index: {}]  }
   0x1   :  { %v37_v0 = vld [vmem:[%s549_s1 + $0x78] sm:$0xff]  ;;  %278 = vmatprep.subr.mxu0 %v373_v1  ;;  %v36_v2 = vld [vmem:[%s549_s1 + $0x70] sm:$0xff]  ;;  %310 = vmatprep.mubr.msk.f32.mxu0 %vm374_vm0, %v373_v1  ;;  %v35_v3 = vld [vmem:[%s549_s1 + $0x68] sm:$0xff] }
   0x2   :  { %279 = vmatpush3.msra.mxu0 %v37_v0  ;;  %313 = vmatprep.subr.mxu1 %v373_v1  ;;  %v34_v4 = vld [vmem:[%s549_s1 + $0x60] sm:$0xff]  ;;  %v131_v5 = vld [vmem:[%s551_s3 + $0x78] sm:$0xff]  ;;  %v130_v6 = vld [vmem:[%s551_s3 + $0x70] sm:$0xff] }
   0x3   :  { %280 = vmatprep.subr.mxu0 %v373_v1  ;;  %345 = vmatprep.mubr.msk.f32.mxu1 %vm374_vm0, %v373_v1  ;;  %v33_v7 = vld [vmem:[%s549_s1 + $0x58] sm:$0xff]  ;;  %v129_v8 = vld [vmem:[%s551_s3 + $0x68] sm:$0xff]  ;;  %v32_v9 = vld [vmem:[%s549_s1 + $0x50] sm:$0xff] }
   0x4   :  { %281 = vmatpush3.msra.mxu0 %v36_v2  ;;  %314 = vmatpush3.msra.mxu1 %v131_v5  ;;  %v128_v10 = vld [vmem:[%s551_s3 + $0x60] sm:$0xff] }
   0x5   :  { %282 = vmatprep.subr.mxu0 %v373_v1  ;;  %315 = vmatprep.subr.mxu1 %v373_v1 }
   0x6   :  { %283 = vmatpush3.msra.mxu0 %v35_v3  ;;  %316 = vmatpush3.msra.mxu1 %v130_v6 }
   0x7   :  { %284 = vmatprep.subr.mxu0 %v373_v1  ;;  %317 = vmatprep.subr.mxu1 %v373_v1 }
   0x8   :  { %285 = vmatpush3.msra.mxu0 %v34_v4  ;;  %318 = vmatpush3.msra.mxu1 %v129_v8 }
   0x9   :  { %286 = vmatprep.subr.mxu0 %v373_v1 }
   0xa   :  { %287 = vmatpush3.msra.mxu0 %v33_v7 }
   0xb   :  { %10 = vsyncpa [#allocation4], 0  ;;  %288 = vmatprep.subr.mxu0 %v373_v1  ;;  %v31_v11 = vld [vmem:[%s549_s1 + $0x48] sm:$0xff]  ;;  %319 = vmatprep.subr.mxu1 %v373_v1  ;;  %v127_v12 = vld [vmem:[%s551_s3 + $0x58] sm:$0xff]  ;;  %s375_s11 = smov [#allocation3]  }
   0xc   :  { %289 = vmatpush3.msra.mxu0 %v32_v9  ;;  %320 = vmatpush3.msra.mxu1 %v128_v10  ;;  %v30_v13 = vld [vmem:[%s549_s1 + $0x40] sm:$0xff]  ;;  %v126_v14 = vld [vmem:[%s551_s3 + $0x50] sm:$0xff]  ;;  %v29_v15 = vld [vmem:[%s549_s1 + $0x38] sm:$0xff]  ;;  %s234_s12 = sshll.u32 %s375_s11, 4  ;;  %s235_s12 = int_to_ptr.vmem [resolvable:$true] %s234_s12 }
   0xd   :  { %290 = vmatprep.subr.mxu0 %v373_v1  ;;  %321 = vmatprep.subr.mxu1 %v373_v1  ;;  %v125_v16 = vld [vmem:[%s551_s3 + $0x48] sm:$0xff]  ;;  %v28_v17 = vld [vmem:[%s549_s1 + $0x30] sm:$0xff]  ;;  %v124_v18 = vld [vmem:[%s551_s3 + $0x40] sm:$0xff]  ;;  %p356_p1 = scmp.lt.s32.totalorder %s235_s12, %s235_s12 }
   0xe   :  { %291 = vmatpush3.msra.mxu0 %v31_v11  ;;  %322 = vmatpush3.msra.mxu1 %v127_v12  ;;  %v27_v19 = vld [vmem:[%s549_s1 + $0x28] sm:$0xff]  ;;  %v123_v20 = vld [vmem:[%s551_s3 + $0x38] sm:$0xff]  ;;  %v26_v21 = vld [vmem:[%s549_s1 + $0x20] sm:$0xff] }
   0xf   :  { %292 = vmatprep.subr.mxu0 %v373_v1  ;;  %323 = vmatprep.subr.mxu1 %v373_v1  ;;  %v122_v22 = vld [vmem:[%s551_s3 + $0x30] sm:$0xff]  ;;  %v25_v23 = vld [vmem:[%s549_s1 + $0x18] sm:$0xff]  ;;  %v121_v24 = vld [vmem:[%s551_s3 + $0x28] sm:$0xff] }
  0x10   :  { %293 = vmatpush3.msra.mxu0 %v30_v13  ;;  %324 = vmatpush3.msra.mxu1 %v126_v14  ;;  %v24_v25 = vld [vmem:[%s549_s1 + $0x10] sm:$0xff]  ;;  %v120_v26 = vld [vmem:[%s551_s3 + $0x20] sm:$0xff]  ;;  %v23_v27 = vld [vmem:[%s549_s1 + $0x8] sm:$0xff] }
  0x11   :  { %294 = vmatprep.subr.mxu0 %v373_v1  ;;  %325 = vmatprep.subr.mxu1 %v373_v1  ;;  %v119_v28 = vld [vmem:[%s551_s3 + $0x18] sm:$0xff]  ;;  %v22_v29 = vld [vmem:[%s549_s1] sm:$0xff]  ;;  %v118_v31 = vld [vmem:[%s551_s3 + $0x10] sm:$0xff] }
  0x12   :  { %295 = vmatpush3.msra.mxu0 %v29_v15  ;;  %326 = vmatpush3.msra.mxu1 %v125_v16  ;;  %v21_v30 = vld [vmem:[%s548_s0] sm:$0xff]  ;;  %v117_v32 = vld [vmem:[%s551_s3 + $0x8] sm:$0xff] }
  0x13   :  { %296 = vmatprep.subr.mxu0 %v373_v1  ;;  %327 = vmatprep.subr.mxu1 %v373_v1  ;;  %v116_v33 = vld [vmem:[%s551_s3] sm:$0xff]  ;;  %s351_s3 = scalar_lea.vmem %s235_s12, 128 }
  0x14   :  { %297 = vmatpush3.msra.mxu0 %v28_v17  ;;  %328 = vmatpush3.msra.mxu1 %v124_v18  ;;  %v242_v34 = vld [vmem:[%s550_s2] ss:$0 sm:$0xff]  ;;  %p352_p0 = scmp.ne.s32.totalorder %s235_s12, %s351_s3  ;;  %p357_p2 = scmp.lt.s32.totalorder %s351_s3, %s351_s3 }
  0x15   :  { %298 = vmatprep.subr.mxu0 %v373_v1  ;;  %329 = vmatprep.subr.mxu1 %v373_v1  ;;  %v243_v39 = vld [vmem:[%s552_s4] ss:$0 sm:$0xff] }
  0x16   :  { %299 = vmatpush3.msra.mxu0 %v27_v19  ;;  %330 = vmatpush3.msra.mxu1 %v123_v20  ;;  %p358_p3 = por %p357_p2, %p356_p1 }
  0x17   :  { %300 = vmatprep.subr.mxu0 %v373_v1  ;;  %331 = vmatprep.subr.mxu1 %v373_v1 }
  0x18   :  { %301 = vmatpush3.msra.mxu0 %v26_v21  ;;  %332 = vmatpush3.msra.mxu1 %v122_v22  ;;  %p359_p4 = pnand %p358_p3, %p352_p0 }
  0x19   :  { %302 = vmatprep.subr.mxu0 %v373_v1  ;;  %333 = vmatprep.subr.mxu1 %v373_v1 }
  0x1a   :  { %303 = vmatpush3.msra.mxu0 %v25_v23  ;;  %334 = vmatpush3.msra.mxu1 %v121_v24 }
  0x1b   :  { %304 = vmatprep.subr.mxu0 %v373_v1  ;;  %335 = vmatprep.subr.mxu1 %v373_v1 }
  0x1c   :  { %305 = vmatpush3.msra.mxu0 %v24_v25  ;;  %336 = vmatpush3.msra.mxu1 %v120_v26 }
  0x1d   :  { %306 = vmatprep.subr.mxu0 %v373_v1  ;;  %337 = vmatprep.subr.mxu1 %v373_v1 }
  0x1e   :  { %307 = vmatpush3.msra.mxu0 %v23_v27  ;;  %338 = vmatpush3.msra.mxu1 %v119_v28 }
  0x1f   :  { %308 = vmatprep.subr.mxu0 %v373_v1  ;;  %339 = vmatprep.subr.mxu1 %v373_v1 }
  0x20   :  { %309 = vmatpush3.msra.mxu0 %v22_v29  ;;  %340 = vmatpush3.msra.mxu1 %v118_v31 }
  0x21   :  { %311 = vmatmul.mubr.f32.vlgmr.msra.gmra.mxu0 %v21_v30  ;;  %341 = vmatprep.subr.mxu1 %v373_v1 }
  0x22   :  { %342 = vmatpush3.msra.mxu1 %v117_v32 }
  0x23   :  { %343 = vmatprep.subr.mxu1 %v373_v1 }
  0x24   :  { %344 = vmatpush3.msra.mxu1 %v116_v33 }
  0xe1   :  { %v111_v35 = vpop.f32.mrf.mxu0 }
  0xe2   :  { %v112_v36 = vadd.f32 %v242_v34, %v111_v35 }
  0xe3   :  { %v312_v37 = vpop.f32.mrf.mxu0 }
  0xe4   :  { %v115_v38 = vmax.f32 %v112_v36, 0.0 }
  0xe6   :  { %346 = vmatmul.mubr.f32.vlgmr.msra.gmra.mxu1 %v115_v38 }
 0x1a6   :  { %v198_v40 = vpop.f32.mrf.mxu1 }
 0x1a7   :  { %v225_v41 = vadd.f32 %v243_v39, %v198_v40 }
 0x1a8   :  { %v347_v42 = vpop.f32.mrf.mxu1 }
 0x1a9   :  { %v226_v43 = vmax.f32 %v225_v41, 0.0 }
 0x1ab   :  { %227 = vst [vmem:[#allocation3] sm:$0xff] %v226_v43 }
 0x1ac   :  { %362 = shalt.err (!%p359_p4)
}
 0x1ad   :  { %237 = dma.vmem_to_hbm [thread:$0]  %s235_s12, 128, %s553_s5, [#allocation4]  }
 0x1ae   :  { %371 = dma.done.wait [#allocation4], 128  }
 0x1af   :  { %372 = vsyncadd [#allocation4], 4294967168 }
 0x1b0   :  { %241 = vsyncpa [#allocation4], 1 }

</bundles_post_ra>
